<compile_context>
chip_gen: v5e
topology: v5e:2x2
jax: 0.10.0
libtpu: 0.0.40
codegen_flags: <defaults>
</compile_context>

<pallas_src>
import functools

import jax
import jax.numpy as jnp
from jax.experimental import pallas as pl
from jax.experimental.pallas import tpu as pltpu


def _proto_agg_sum_kernel(w_ref, x_ref, o_ref, acc_ref, *, inv_n_protos):
    # w_ref  : (TPg, L)  f32    prototype-weight tile
    # x_ref  : (TB, TPg, L)     batch x proto tile (lane-dense layout)
    # o_ref  : (TB, L)          output tile
    # acc_ref: (TB, L)   f32    running sum over the proto grid axis
    p = pl.program_id(1)

    @pl.when(p == 0)
    def _():
        acc_ref[...] = jnp.zeros_like(acc_ref)

    prod = x_ref[...] * w_ref[...]                      # promotes to f32 (w is f32)
    acc_ref[...] += jnp.sum(prod, axis=1, dtype=jnp.float32)

    @pl.when(p == pl.num_programs(1) - 1)
    def _():
        o_ref[...] = (acc_ref[...] * inv_n_protos).astype(o_ref.dtype)


_TOPOLOGY = None


def _tpu_topology():
    """(vmem_capacity_bytes_per_core, tensorcores_per_chip) with safe fallbacks."""
    global _TOPOLOGY
    if _TOPOLOGY is None:
        vmem = 128 << 20
        num_tc = 1
        try:
            info = pltpu.get_tpu_info()
            vmem = int(getattr(info, "vmem_capacity_bytes", vmem))
        except Exception:
            pass
        try:
            kind = jax.devices()[0].device_kind.lower()
        except Exception:
            kind = ""
        if "7" in kind:                  # v7x: 2 TensorCores, 64 MiB VMEM per TC
            vmem = min(vmem, 64 << 20)
            num_tc = 2
        elif vmem <= (64 << 20):         # VMEM-capacity fallback heuristic
            num_tc = 2
        _TOPOLOGY = (vmem, num_tc)
    return _TOPOLOGY


def _plan_tiling(B, Pg, L, x_itemsize, vmem_bytes, num_tc):
    """Pick (TB, TPg): batch-tile rows and proto-tile rows."""
    usable = (vmem_bytes * 3) // 4                       # stay under 0.75 * VMEM
    # Per byte of x tile we need: 2 double-buffered copies + an f32 product temp.
    denom = 2.0 + 4.0 / x_itemsize
    x_tile_budget = int((usable - (8 << 20)) / denom)
    x_tile_budget = max(1 << 20, min(x_tile_budget, 32 << 20))

    # Proto-axis split: only when even a minimal 8-row batch tile would blow the
    # x-tile budget.  Only exact (multiple-of-8) divisors of Pg are used so the
    # reduction axis never sees a padded partial block.
    TPg = Pg
    if Pg >= 16 and 8 * Pg * L * x_itemsize > x_tile_budget:
        cap = max(8, (x_tile_budget // (8 * L * x_itemsize)) // 8 * 8)
        for cand in range(int(cap), 7, -8):
            if Pg % cand == 0:
                TPg = cand
                break

    row_bytes = TPg * L * x_itemsize
    TB = max(1, x_tile_budget // row_bytes)
    if num_tc >= 2 and B >= 16:
        TB = min(TB, pl.cdiv(B, 2))                      # >= 2 batch steps (megacore)
    if TB < B:
        TB = max(8, (TB // 8) * 8)                       # (8,128) rule on (TB, L) block
    if TB >= B:
        TB = B
    return int(TB), int(TPg)


def _proto_agg_sum(weights_protos: jax.Array, x: jax.Array) -> jax.Array:
    """weights_protos: (P, D); x: (B, P, D) -> (B, D) == mean_p(w * x)."""
    B, P, D = x.shape
    assert weights_protos.shape == (P, D)

    # Lane-dense regrouping: (B, P, D) -> (B, P//G, G*D) with G*D == 128.
    G = 1
    if D < 128 and 128 % D == 0 and P % (128 // D) == 0:
        G = 128 // D
    Pg, L = P // G, G * D

    w = weights_protos.astype(jnp.float32).reshape(Pg, L)    # tiny; keep f32
    x_r = x.reshape(B, Pg, L)
    x_itemsize = jnp.dtype(x.dtype).itemsize

    vmem_bytes, num_tc = _tpu_topology()
    TB, TPg = _plan_tiling(B, Pg, L, x_itemsize, vmem_bytes, num_tc)
    grid = (pl.cdiv(B, TB), pl.cdiv(Pg, TPg))

    # If lane groups still need folding, keep the kernel output in f32 and fold
    # + cast in one fused XLA pass; otherwise write x.dtype directly.
    out_dtype = jnp.float32 if G > 1 else x.dtype

    # VMEM budget: double-buffered x / w / out + f32 accumulator + product temp.
    x_tile = TB * TPg * L * x_itemsize
    w_tile = TPg * L * 4
    o_tile = TB * L * jnp.dtype(out_dtype).itemsize
    need = 2 * (x_tile + w_tile + o_tile) + TB * L * 4 + TB * TPg * L * 4
    vmem_limit = int(min(max(need + (4 << 20), 16 << 20), (vmem_bytes * 3) // 4))

    kernel = functools.partial(_proto_agg_sum_kernel, inv_n_protos=1.0 / float(P))

    out = pl.pallas_call(
        kernel,
        out_shape=jax.ShapeDtypeStruct((B, L), out_dtype),
        grid_spec=pltpu.PrefetchScalarGridSpec(
            num_scalar_prefetch=0,
            grid=grid,
            in_specs=[
                pl.BlockSpec((TPg, L), lambda i, p: (p, 0)),         # weights
                pl.BlockSpec((TB, TPg, L), lambda i, p: (i, p, 0)),  # x tile
            ],
            out_specs=pl.BlockSpec((TB, L), lambda i, p: (i, 0)),
            scratch_shapes=[pltpu.VMEM((TB, L), jnp.float32)],
        ),
        compiler_params=pltpu.CompilerParams(
            dimension_semantics=("parallel", "arbitrary"),
            vmem_limit_bytes=vmem_limit,
        ),
    )(w, x_r)

    if G > 1:
        # Fold the G lane-groups back to D features (tiny, fuses under jit).
        out = out.reshape(B, G, D).sum(axis=1).astype(x.dtype)
    return out


proto_agg_sum = jax.jit(_proto_agg_sum)


if __name__ == "__main__":
    # Small shapes consistent with the module: batch=2, n_protos=8, dim_protos=32.
    B, n_protos, dim_protos = 2, 8, 32

    key = jax.random.PRNGKey(0)
    kx, kw = jax.random.split(key)
    x = jax.random.normal(kx, (B, n_protos, dim_protos), dtype=jnp.float32)

    # Parameter init matching torch.ones(n_protos, dim_protos).
    weights_protos = jnp.ones((n_protos, dim_protos), dtype=jnp.float32)

    out = jax.block_until_ready(proto_agg_sum(weights_protos, x))
    ref = jnp.mean(weights_protos[None] * x, axis=1)
    assert out.shape == (B, dim_protos)
    assert out.dtype == x.dtype
    assert jnp.allclose(out, ref, atol=1e-5, rtol=1e-5)

    # Non-trivial ("trained") weights to exercise the multiply path.
    w2 = jax.random.normal(kw, (n_protos, dim_protos), dtype=jnp.float32)
    out2 = jax.block_until_ready(proto_agg_sum(w2, x))
    ref2 = jnp.mean(w2[None] * x, axis=1)
    assert jnp.allclose(out2, ref2, atol=1e-5, rtol=1e-5)

    print("KERNEL_OK")
</pallas_src>

<mosaic_0001>
module attributes {stable_mosaic.version = 11 : i64} {
  func.func @_proto_agg_sum_kernel(%arg0: i32, %arg1: i32, %arg2: memref<2x128xf32, #tpu.memory_space<vmem>>, %arg3: memref<2x2x128xf32, #tpu.memory_space<vmem>>, %arg4: memref<2x128xf32, #tpu.memory_space<vmem>>, %arg5: memref<2x128xf32, #tpu.memory_space<vmem>>) attributes {dimension_semantics = [#tpu.dimension_semantics<parallel>, #tpu.dimension_semantics<arbitrary>], iteration_bounds = array<i64: 1, 1>, scalar_prefetch = 0 : i64, scratch_operands = 1 : i64, tpu.core_type = #tpu.core_type<tc>, window_params = [{transform_indices = @transform_0, window_bounds = array<i64: 2, 128>}, {transform_indices = @transform_1, window_bounds = array<i64: 2, 2, 128>}, {transform_indices = @transform_2, window_bounds = array<i64: 2, 128>}]} {
    %c0_i32 = arith.constant 0 : i32
    %0 = arith.cmpi eq, %arg1, %c0_i32 : i32
    %1 = arith.extui %0 : i1 to i32
    %c0_i32_0 = arith.constant 0 : i32
    %2 = arith.cmpi ne, %1, %c0_i32_0 : i32
    scf.if %2 {
      %cst_11 = arith.constant 0.000000e+00 : f32
      %15 = vector.broadcast %cst_11 : f32 to vector<2x128xf32>
      %c0_12 = arith.constant 0 : index
      %c0_13 = arith.constant 0 : index
      %16 = vector.load %arg5[%c0_12, %c0_13] : memref<2x128xf32, #tpu.memory_space<vmem>>, vector<2x128xf32>
      tpu.vector_store %arg5[%c0_12, %c0_13], %15 {strides = array<i32>} : memref<2x128xf32, #tpu.memory_space<vmem>>, vector<2x128xf32>,
    } else {
    }
    %c0 = arith.constant 0 : index
    %c0_1 = arith.constant 0 : index
    %c0_2 = arith.constant 0 : index
    %3 = vector.load %arg3[%c0, %c0_1, %c0_2] : memref<2x2x128xf32, #tpu.memory_space<vmem>>, vector<2x2x128xf32>
    %c0_3 = arith.constant 0 : index
    %c0_4 = arith.constant 0 : index
    %4 = vector.load %arg2[%c0_3, %c0_4] : memref<2x128xf32, #tpu.memory_space<vmem>>, vector<2x128xf32>
    %5 = vector.shape_cast %4 : vector<2x128xf32> to vector<1x2x128xf32>
    %6 = vector.broadcast %5 : vector<1x2x128xf32> to vector<2x2x128xf32>
    %7 = arith.mulf %3, %6 : vector<2x2x128xf32>
    %c0_5 = arith.constant 0 : index
    %c0_6 = arith.constant 0 : index
    %8 = vector.load %arg5[%c0_5, %c0_6] : memref<2x128xf32, #tpu.memory_space<vmem>>, vector<2x128xf32>
    %cst = arith.constant dense<0.000000e+00> : vector<2x128xf32>
    %9 = vector.multi_reduction <add>, %7, %cst [1] : vector<2x2x128xf32> to vector<2x128xf32>
    %10 = arith.addf %8, %9 : vector<2x128xf32>
    %c0_7 = arith.constant 0 : index
    %c0_8 = arith.constant 0 : index
    %11 = vector.load %arg5[%c0_7, %c0_8] : memref<2x128xf32, #tpu.memory_space<vmem>>, vector<2x128xf32>
    tpu.vector_store %arg5[%c0_7, %c0_8], %10 {strides = array<i32>} : memref<2x128xf32, #tpu.memory_space<vmem>>, vector<2x128xf32>,
    %c0_i32_9 = arith.constant 0 : i32
    %12 = arith.cmpi eq, %arg1, %c0_i32_9 : i32
    %13 = arith.extui %12 : i1 to i32
    %c0_i32_10 = arith.constant 0 : i32
    %14 = arith.cmpi ne, %13, %c0_i32_10 : i32
    scf.if %14 {
      %c0_11 = arith.constant 0 : index
      %c0_12 = arith.constant 0 : index
      %15 = vector.load %arg5[%c0_11, %c0_12] : memref<2x128xf32, #tpu.memory_space<vmem>>, vector<2x128xf32>
      %cst_13 = arith.constant 1.250000e-01 : f32
      %16 = vector.broadcast %cst_13 : f32 to vector<2x128xf32>
      %17 = arith.mulf %15, %16 : vector<2x128xf32>
      %c0_14 = arith.constant 0 : index
      %c0_15 = arith.constant 0 : index
      %18 = vector.load %arg4[%c0_14, %c0_15] : memref<2x128xf32, #tpu.memory_space<vmem>>, vector<2x128xf32>
      tpu.vector_store %arg4[%c0_14, %c0_15], %17 {strides = array<i32>} : memref<2x128xf32, #tpu.memory_space<vmem>>, vector<2x128xf32>,
    } else {
    }
    return
  }
  func.func @transform_0(%arg0: i32, %arg1: i32) -> (i32, i32) {
    %c0_i32 = arith.constant 0 : i32
    %c0_i32_0 = arith.constant 0 : i32
    return %arg1, %c0_i32 : i32, i32
  }
  func.func @transform_1(%arg0: i32, %arg1: i32) -> (i32, i32, i32) {
    %c0_i32 = arith.constant 0 : i32
    %c0_i32_0 = arith.constant 0 : i32
    return %arg0, %arg1, %c0_i32 : i32, i32, i32
  }
  func.func @transform_2(%arg0: i32, %arg1: i32) -> (i32, i32) {
    %c0_i32 = arith.constant 0 : i32
    %c0_i32_0 = arith.constant 0 : i32
    return %arg0, %c0_i32 : i32, i32
  }
}

</mosaic_0001>

<bundles_post_ra>
// kernel: _proto_agg_sum.1
= control target key start
LH: loop header
LB: loop body
LE: loop exit
PB: predicated region body
PF: predicated region fallthrough
CT: control target
= control target key end

     0   :  { %v55_v0 = vmov 0.0   ;;  %vm22_vm0 = vcmask 1041408   ;;  %vm39_vm1 = vcmask 1041409   ;;  %s83_s0 = inlined_call_operand.vmem [shape: f32[2,128], index: 0, kind: input, shape index: {}]   ;;  %s84_s1 = inlined_call_operand.vmem [shape: f32[2,2,128], index: 1, kind: input, shape index: {}]   ;;  %s85_s2 = inlined_call_operand.vmem [shape: f32[2,128], index: 2, kind: output, shape index: {}]  }
   0x1   :  { %15 = vst [vmem:[#allocation2] sm:$0x3] %v55_v0  ;;  %v16_v1 = vld [vmem:[%s84_s1] sm:$0x3]  ;;  %v17_v2 = vld [vmem:[%s84_s1 + $0x2] sm:$0x3] }
   0x2   :  { %v18_v3 = vld [vmem:[%s83_s0] sm:$0x3] }
   0x3   :  { %v19_v4 = vmul.f32 %v18_v3, %v16_v1  ;;  %v20_v5 = vmul.f32 %v18_v3, %v17_v2 }
   0x5   :  { %v23_v6 = vsel %vm22_vm0, %v19_v4, 0.0  ;;  %v30_v7 = vsel %vm22_vm0, %v20_v5, 0.0 }
   0x6   :  { %v24_v8 = vrot.slane %v23_v6, 4  ;;  %v31_v9 = vrot.slane %v30_v7, 4 }
   0x8   :  { %v25_v10 = vadd.f32 %v24_v8, %v23_v6  ;;  %v32_v11 = vadd.f32 %v31_v9, %v30_v7  ;;  %v21_v18 = vld [vmem:[#allocation2] sm:$0x3] }
   0xa   :  { %v26_v12 = vrot.slane %v25_v10, 2  ;;  %v33_v13 = vrot.slane %v32_v11, 2 }
   0xc   :  { %v27_v14 = vadd.f32 %v26_v12, %v25_v10  ;;  %v34_v15 = vadd.f32 %v33_v13, %v32_v11 }
   0xe   :  { %v28_v16 = vrot.slane %v27_v14, 1  ;;  %v35_v17 = vrot.slane %v34_v15, 1 }
  0x10   :  { %v29_v19 = vadd.f32 %v28_v16, %v27_v14  ;;  %v36_v20 = vadd.f32 %v35_v17, %v34_v15 }
  0x12   :  { %v40_v21 = vsel %vm39_vm1, %v36_v20, %v29_v19 }
  0x13   :  { %v42_v22 = vadd.f32 %v40_v21, %v21_v18 }
  0x15   :  { %43 = vst [vmem:[#allocation2] sm:$0x3] %v42_v22 }
  0x1c   :  { %v47_v23 = vld [vmem:[#allocation2] sm:$0x3] }
  0x1d   :  { %v48_v24 = vmul.f32 0.125, %v47_v23 }
  0x1f   :  { %49 = vst [vmem:[%s85_s2] sm:$0x3] %v48_v24 }

</bundles_post_ra>
